<compile_context>
chip_gen: v7x
topology: tpu7x:2x2x1
jax: 0.10.0
libtpu: 0.0.40
codegen_flags: <defaults>
</compile_context>

<pallas_src>
import math

import jax
import jax.numpy as jnp
from jax.experimental import pallas as pl
from jax.experimental.pallas import tpu as pltpu


_LANE = 128                     # vreg lane width
_TILE_BUDGET_BYTES = 2 << 20    # ~2 MiB per tile: bandwidth-saturating, small
                                #   enough for deep pipelining + 2-TC sharding
_MIN_GRID_STEPS = 8             # keep both v7x TensorCores fed / real overlap
_MAX_XLU_TILE = 512             # cap lane<->sublane transpose tile extents so
                                #   the XLU transpose streams vreg-by-vreg


def _cdiv(a, b):
    return -(-a // b)


def _sublane_multiple(itemsize):
    # Packed dtypes need taller sublane tiles: f32 -> 8, bf16 -> 16, int8 -> 32.
    return {4: 8, 2: 16, 1: 32}.get(itemsize, 8)


def _vmem_limit_bytes():
    """Scoped VMEM limit: 3/4 of physical capacity, queried from the runtime."""
    cap = 0
    try:
        info = pltpu.get_tpu_info()
        cap = int(getattr(info, "vmem_capacity_bytes", 0) or 0)
    except Exception:
        cap = 0
    if cap <= 0:
        kind = ""
        try:
            kind = jax.devices()[0].device_kind.lower()
        except Exception:
            pass
        # v5e/v6e: 128 MiB physical; v7x / unknown: 64 MiB (conservative).
        cap = (128 << 20) if ("v5" in kind or "v6" in kind) else (64 << 20)
    return (3 * cap) // 4


# --------------------------------------------------------------------------
# kernels
# --------------------------------------------------------------------------
def _swap_sublane_kernel(x_ref, o_ref):
    # (tP, tA, tQ, tB, tR) -> (tP, tB, tQ, tA, tR).
    # R stays the lane axis, so the A<->B swap is a sublane/major shuffle only.
    o_ref[...] = jnp.swapaxes(x_ref[...], 1, 3)


def _xpose_minor_kernel(x_ref, o_ref):
    # (tP, tA, tB) -> (tP, tB, tA): batched lane<->sublane (XLU) transpose.
    o_ref[...] = jnp.swapaxes(x_ref[...], 1, 2)


def _xpose_mid_q_kernel(x_ref, o_ref):
    # (tP, tA, tQ, tB) -> (tP, tB, tQ, tA), staged so every intermediate keeps
    # a lane-dense minor dim: major<->sublane, XLU 2-D, major<->sublane.
    x = jnp.swapaxes(x_ref[...], 1, 2)    # (tP, tQ, tA, tB)
    x = jnp.swapaxes(x, 2, 3)             # (tP, tQ, tB, tA)
    o_ref[...] = jnp.swapaxes(x, 1, 2)    # (tP, tB, tQ, tA)


# --------------------------------------------------------------------------
# tile planning
# --------------------------------------------------------------------------
def _shrink(t, dim, mult):
    """Halve a tile extent; non-full tiles stay multiples of `mult`."""
    if t <= mult:
        return t
    new = max(mult, ((t // 2) // mult) * mult)
    return min(new, dim)


def _enforce_min_steps(dims, tiles, mults, floors, priority, min_steps):
    """Shrink tiles (priority order, round-robin) until the grid has enough
    steps to feed both v7x TensorCores and keep the pipeline overlapped."""
    tiles = list(tiles)

    def n_steps():
        return math.prod(_cdiv(d, t) for d, t in zip(dims, tiles))

    progress = True
    while n_steps() < min_steps and progress:
        progress = False
        for i in priority:
            if n_steps() >= min_steps:
                break
            if tiles[i] > floors[i]:
                new = max(_shrink(tiles[i], dims[i], mults[i]), floors[i])
                if new < tiles[i]:
                    tiles[i] = new
                    progress = True
    return tuple(tiles)


def _plan_general(P, A, Q, B, R, itemsize, budget):
    """Tiles (tP, tA, tQ, tB, tR) for the (P,A,Q,B,R)->(P,B,Q,A,R) path."""
    sub = _sublane_multiple(itemsize)
    tA, tB, tR = A, B, R
    turn = 0
    # Shrink tA / tB alternately (balanced read/write DMA burst length),
    # only then give up lane width on R.
    while tA * tB * tR * itemsize > budget:
        can_a, can_b = tA > sub, tB > sub
        if can_a and (turn == 0 or not can_b):
            tA = _shrink(tA, A, sub)
        elif can_b:
            tB = _shrink(tB, B, sub)
        elif tR > _LANE:
            tR = _shrink(tR, R, _LANE)
        else:
            break
        turn ^= 1
    # Fold Q then P into the block to amortize the ~0.35 us per-step overhead
    # when A*B*R is small (batched small transposes).
    per = tA * tB * tR * itemsize
    tQ, tP = 1, 1
    if per <= budget:
        tQ = max(1, min(Q, budget // per))
        per *= tQ
        tP = max(1, min(P, budget // per))
    dims = (P, A, Q, B, R)
    tiles = (tP, tA, tQ, tB, tR)
    mults = (1, sub, 1, sub, _LANE)
    floors = (1, min(A, sub), 1, min(B, sub), min(R, _LANE))
    # Undo P/Q batching first, then split A/B; never shrink R (lane density).
    return _enforce_min_steps(dims, tiles, mults, floors, (0, 2, 1, 3),
                              _MIN_GRID_STEPS)


def _plan_xlu_q(P, A, Q, B, itemsize, budget):
    """Tiles (tP, tA, tQ, tB) for the R==1, Q>1 path (A/B are lane axes)."""
    sub = _sublane_multiple(itemsize)
    tA = A if A <= _MAX_XLU_TILE else _MAX_XLU_TILE
    tB = B if B <= _MAX_XLU_TILE else _MAX_XLU_TILE
    tQ = Q if Q <= sub else sub
    turn = 0
    while tA * tB * tQ * itemsize > budget:
        can_a, can_b = tA > _LANE, tB > _LANE
        if can_a and (turn == 0 or not can_b):
            tA = _shrink(tA, A, _LANE)
        elif can_b:
            tB = _shrink(tB, B, _LANE)
        else:
            break
        turn ^= 1
    # Grow Q (sublane multiples) then P to fill the budget.
    base = tA * tB * itemsize
    max_q = max(1, budget // base)
    if max_q >= Q:
        tQ = Q
    elif max_q >= sub:
        tQ = (max_q // sub) * sub
    per = tA * tB * tQ * itemsize
    tP = max(1, min(P, budget // per)) if per <= budget else 1
    dims = (P, A, Q, B)
    tiles = (tP, tA, tQ, tB)
    mults = (1, _LANE, sub, _LANE)
    floors = (1, min(A, _LANE), min(Q, sub), min(B, _LANE))
    return _enforce_min_steps(dims, tiles, mults, floors, (0, 2, 1, 3),
                              _MIN_GRID_STEPS)


def _plan_xlu(P, A, B, itemsize, budget):
    """Tiles (tP, tA, tB) for the last-two-dims (R==1, Q==1) path."""
    tA = A if A <= _MAX_XLU_TILE else _MAX_XLU_TILE
    tB = B if B <= _MAX_XLU_TILE else _MAX_XLU_TILE
    turn = 0
    while tA * tB * itemsize > budget:
        can_a, can_b = tA > _LANE, tB > _LANE
        if can_a and (turn == 0 or not can_b):
            tA = _shrink(tA, A, _LANE)
        elif can_b:
            tB = _shrink(tB, B, _LANE)
        else:
            break
        turn ^= 1
    per = tA * tB * itemsize
    tP = max(1, min(P, budget // per)) if per <= budget else 1
    dims = (P, A, B)
    tiles = (tP, tA, tB)
    mults = (1, _LANE, _LANE)
    floors = (1, min(A, _LANE), min(B, _LANE))
    return _enforce_min_steps(dims, tiles, mults, floors, (0, 1, 2),
                              _MIN_GRID_STEPS)


# --------------------------------------------------------------------------
# pallas_call wrappers
# --------------------------------------------------------------------------
def _bw_params(grid, vmem_limit):
    return pltpu.CompilerParams(
        dimension_semantics=("parallel",) * len(grid),
        vmem_limit_bytes=vmem_limit,
    )


def _call_general(x5, itemsize, budget, vmem_limit):
    P, A, Q, B, R = x5.shape
    tP, tA, tQ, tB, tR = _plan_general(P, A, Q, B, R, itemsize, budget)
    grid = (_cdiv(P, tP), _cdiv(Q, tQ), _cdiv(A, tA), _cdiv(B, tB), _cdiv(R, tR))
    return pl.pallas_call(
        _swap_sublane_kernel,
        out_shape=jax.ShapeDtypeStruct((P, B, Q, A, R), x5.dtype),
        grid_spec=pltpu.PrefetchScalarGridSpec(
            num_scalar_prefetch=0,
            grid=grid,
            in_specs=[pl.BlockSpec((tP, tA, tQ, tB, tR),
                                   lambda p, q, a, b, r: (p, a, q, b, r))],
            out_specs=pl.BlockSpec((tP, tB, tQ, tA, tR),
                                   lambda p, q, a, b, r: (p, b, q, a, r)),
        ),
        compiler_params=_bw_params(grid, vmem_limit),
        cost_estimate=pl.CostEstimate(
            flops=0, transcendentals=0,
            bytes_accessed=2 * P * A * Q * B * R * itemsize),
    )(x5)


def _call_xpose_mid(x4, itemsize, budget, vmem_limit):
    P, A, Q, B = x4.shape
    tP, tA, tQ, tB = _plan_xlu_q(P, A, Q, B, itemsize, budget)
    grid = (_cdiv(P, tP), _cdiv(Q, tQ), _cdiv(A, tA), _cdiv(B, tB))
    return pl.pallas_call(
        _xpose_mid_q_kernel,
        out_shape=jax.ShapeDtypeStruct((P, B, Q, A), x4.dtype),
        grid_spec=pltpu.PrefetchScalarGridSpec(
            num_scalar_prefetch=0,
            grid=grid,
            in_specs=[pl.BlockSpec((tP, tA, tQ, tB),
                                   lambda p, q, a, b: (p, a, q, b))],
            out_specs=pl.BlockSpec((tP, tB, tQ, tA),
                                   lambda p, q, a, b: (p, b, q, a)),
        ),
        compiler_params=_bw_params(grid, vmem_limit),
        cost_estimate=pl.CostEstimate(
            flops=0, transcendentals=0,
            bytes_accessed=2 * P * A * Q * B * itemsize),
    )(x4)


def _call_xpose_last2(x3, itemsize, budget, vmem_limit):
    P, A, B = x3.shape
    tP, tA, tB = _plan_xlu(P, A, B, itemsize, budget)
    grid = (_cdiv(P, tP), _cdiv(A, tA), _cdiv(B, tB))
    return pl.pallas_call(
        _xpose_minor_kernel,
        out_shape=jax.ShapeDtypeStruct((P, B, A), x3.dtype),
        grid_spec=pltpu.PrefetchScalarGridSpec(
            num_scalar_prefetch=0,
            grid=grid,
            in_specs=[pl.BlockSpec((tP, tA, tB), lambda p, a, b: (p, a, b))],
            out_specs=pl.BlockSpec((tP, tB, tA), lambda p, a, b: (p, b, a)),
        ),
        compiler_params=_bw_params(grid, vmem_limit),
        cost_estimate=pl.CostEstimate(
            flops=0, transcendentals=0, bytes_accessed=2 * P * A * B * itemsize),
    )(x3)


# --------------------------------------------------------------------------
# public wrapper
# --------------------------------------------------------------------------
def transpose_pallas(x, dim_1, dim_2):
    """Equivalent of torch.Tensor.transpose(dim_1, dim_2)."""
    nd = x.ndim
    d1 = dim_1 % nd
    d2 = dim_2 % nd
    if d1 == d2:
        return x
    if d1 > d2:
        d1, d2 = d2, d1

    shape = x.shape
    out_shape = (shape[:d1] + (shape[d2],) + shape[d1 + 1:d2]
                 + (shape[d1],) + shape[d2 + 1:])
    if any(s == 0 for s in shape):
        return jnp.zeros(out_shape, x.dtype)

    P = math.prod(shape[:d1])
    A = shape[d1]
    Q = math.prod(shape[d1 + 1:d2])
    B = shape[d2]
    R = math.prod(shape[d2 + 1:])

    if A == 1 or B == 1:
        # Swapping a size-1 axis never moves data: pure reshape.
        return x.reshape(out_shape)

    itemsize = jnp.dtype(x.dtype).itemsize
    vmem_limit = _vmem_limit_bytes()
    budget = min(_TILE_BUDGET_BYTES, vmem_limit // 8)

    if R == 1:
        if Q == 1:
            # Transposing the last two (effective) dims: batched XLU transpose.
            out3 = _call_xpose_last2(x.reshape(P, A, B), itemsize, budget,
                                     vmem_limit)
            return out3.reshape(out_shape)
        # dim_2 is the last dim but with dims in between: lane-dense staged
        # transpose instead of the old lane-width-1 general path.
        out4 = _call_xpose_mid(x.reshape(P, A, Q, B), itemsize, budget,
                               vmem_limit)
        return out4.reshape(out_shape)

    # ---- general path: R (>1) stays the lane axis -------------------------
    orig_dtype = x.dtype
    x5 = x.reshape(P, A, Q, B, R)
    packed = False
    if itemsize < 4 and (R * itemsize) % (4 * _LANE) == 0:
        # Fold the trailing dim into 32-bit words: identical bytes moved, but
        # the sublane swap runs at f32 relayout cost and lanes stay fully dense.
        per_word = 4 // itemsize
        words = R // per_word
        x5 = jax.lax.bitcast_convert_type(
            x5.reshape(P, A, Q, B, words, per_word), jnp.uint32)
        R, itemsize = words, 4
        packed = True
    # TODO(synk): 1 < R < 128 is correct but lane-sparse (stores fill only
    # R/128 of each vreg); a lane-dense variant needs an in-kernel
    # (tA, tB*R) <-> (tB, tA*R) repack, which Mosaic relayouts make costly.
    out5 = _call_general(x5, itemsize, budget, vmem_limit)   # (P, B, Q, A, R)
    if packed:
        out5 = jax.lax.bitcast_convert_type(out5, orig_dtype)
    return out5.reshape(out_shape)


class Transpose:
    """Mirror of the PyTorch module (no parameters)."""

    def __init__(self, dim_1, dim_2):
        self.dim_1 = dim_1
        self.dim_2 = dim_2

    def __call__(self, x):
        return transpose_pallas(x, self.dim_1, self.dim_2)


if __name__ == "__main__":
    key = jax.random.PRNGKey(0)
    ks = jax.random.split(key, 6)

    def _check(x, d1, d2, name):
        out = jax.block_until_ready(Transpose(d1, d2)(x))
        ref = jnp.swapaxes(x, d1, d2)
        assert out.shape == ref.shape and out.dtype == ref.dtype, name
        assert jnp.array_equal(out, ref), f"mismatch vs reference ({name})"

    # 1) general path (R = 128 lane-dense), small A/B.
    _check(jax.random.normal(ks[0], (2, 4, 16, 128), jnp.float32), 1, 2,
           "general")
    # 2) last-two-dims path: batched lane<->sublane XLU transpose.
    _check(jax.random.normal(ks[1], (2, 8, 128, 128), jnp.float32), -2, -1,
           "last2")
    # 3) R == 1 with intermediate dims (Q > 1): new lane-dense staged path.
    _check(jax.random.normal(ks[2], (2, 64, 16, 128), jnp.float32), 1, 3,
           "r1_q_gt_1")
    # 4) non-tile-divisible dims -> partial-block masking through the swap.
    _check(jax.random.normal(ks[3], (2, 20, 12, 130), jnp.float32), 1, 2,
           "ragged")
    # 5) bf16 general path -> 32-bit lane-packing round trip.
    xb = jax.random.normal(ks[4], (2, 4, 8, 256), jnp.float32).astype(jnp.bfloat16)
    _check(xb, 1, 2, "bf16_packed")
    # 6) general path with Q > 1 and R > 1 (Q folded into the block).
    _check(jax.random.normal(ks[5], (2, 6, 4, 10, 128), jnp.float32), 1, 3,
           "q_and_r")

    print("KERNEL_OK")
</pallas_src>

<mosaic_0001>
module attributes {stable_mosaic.version = 11 : i64} {
  func.func @_swap_sublane_kernel(%arg0: i32, %arg1: i32, %arg2: i32, %arg3: i32, %arg4: i32, %arg5: memref<1x4x1x8x128xf32, #tpu.memory_space<vmem>>, %arg6: memref<1x8x1x4x128xf32, #tpu.memory_space<vmem>>) attributes {dimension_semantics = [#tpu.dimension_semantics<parallel>, #tpu.dimension_semantics<parallel>, #tpu.dimension_semantics<parallel>, #tpu.dimension_semantics<parallel>, #tpu.dimension_semantics<parallel>], iteration_bounds = array<i64: 2, 1, 1, 2, 1>, scalar_prefetch = 0 : i64, scratch_operands = 0 : i64, tpu.core_type = #tpu.core_type<tc>, window_params = [{transform_indices = @transform_0, window_bounds = array<i64: 1, 4, 1, 8, 128>}, {transform_indices = @transform_1, window_bounds = array<i64: 1, 8, 1, 4, 128>}]} {
    %c0 = arith.constant 0 : index
    %c0_0 = arith.constant 0 : index
    %c0_1 = arith.constant 0 : index
    %c0_2 = arith.constant 0 : index
    %c0_3 = arith.constant 0 : index
    %0 = vector.load %arg5[%c0, %c0_0, %c0_1, %c0_2, %c0_3] : memref<1x4x1x8x128xf32, #tpu.memory_space<vmem>>, vector<1x4x1x8x128xf32>
    %1 = tpu.transpose %0, [0, 3, 2, 1, 4] : vector<1x4x1x8x128xf32> -> vector<1x8x1x4x128xf32>
    %c0_4 = arith.constant 0 : index
    %c0_5 = arith.constant 0 : index
    %c0_6 = arith.constant 0 : index
    %c0_7 = arith.constant 0 : index
    %c0_8 = arith.constant 0 : index
    %2 = vector.load %arg6[%c0_4, %c0_5, %c0_6, %c0_7, %c0_8] : memref<1x8x1x4x128xf32, #tpu.memory_space<vmem>>, vector<1x8x1x4x128xf32>
    tpu.vector_store %arg6[%c0_4, %c0_5, %c0_6, %c0_7, %c0_8], %1 {strides = array<i32>} : memref<1x8x1x4x128xf32, #tpu.memory_space<vmem>>, vector<1x8x1x4x128xf32>,
    return
  }
  func.func @transform_0(%arg0: i32, %arg1: i32, %arg2: i32, %arg3: i32, %arg4: i32) -> (i32, i32, i32, i32, i32) {
    %c0_i32 = arith.constant 0 : i32
    return %arg0, %arg2, %arg1, %arg3, %arg4 : i32, i32, i32, i32, i32
  }
  func.func @transform_1(%arg0: i32, %arg1: i32, %arg2: i32, %arg3: i32, %arg4: i32) -> (i32, i32, i32, i32, i32) {
    %c0_i32 = arith.constant 0 : i32
    return %arg0, %arg3, %arg1, %arg2, %arg4 : i32, i32, i32, i32, i32
  }
}

</mosaic_0001>

<bundles_post_ra>
// kernel: tpu_custom_call.1
= control target key start
LH: loop header
LB: loop body
LE: loop exit
PB: predicated region body
PF: predicated region fallthrough
CT: control target
= control target key end

     0   :  { %6 = vsyncpa [#allocation3], 0  ;;  %s857_s0 = inlined_call_operand.hbm [shape: f32[2,4,1,16,128], index: 0, kind: input, shape index: {}]   ;;  %s858_s1 = inlined_call_operand.hbm [shape: f32[2,16,1,4,128], index: 1, kind: output, shape index: {}]  }
   0x1   :  { %8 = vsyncpa [#allocation3 + $0x1], 0 }
   0x2   :  { %9 = vsyncpa [#allocation4], 0 }
   0x3   :  { %11 = vsyncpa [#allocation4 + $0x1], 0  ;;  %s658_s6 = smov 0   ;;  %s660_s7 = smov 0  }
   0x4   :  { %s662_s8 = smov 0   ;;  %s664_s9 = smov 0  }
   0x5   :  { %s666_s10 = smov 0   ;;  %s668_s11 = smov 0  }
   0x6   :  { %s670_s12 = smov 0   ;;  %s672_s13 = smov 0  }
   0x7 LB: > { %s398_s14 = sadd.s32 4294967295, %s636_s13   ;;  %s399_s15 = sadd.s32 4294967294, %s636_s13   ;;  %s636_s13 = sphi %s672_s13, %s17_s13   ;;  %s632_s12 = sphi %s670_s12, %s873_s12   ;;  %s628_s11 = sphi %s668_s11, %s872_s11   ;;  %s624_s10 = sphi %s666_s10, %s871_s10   ;;  %s620_s9 = sphi %s664_s9, %s870_s9   ;;  %s616_s8 = sphi %s662_s8, %s869_s8   ;;  %s612_s7 = sphi %s660_s7, %s868_s7   ;;  %s608_s6 = sphi %s658_s6, %s867_s6  }
   0x8   : > { %s38_s16 = sadd.s32 1, %s628_s11  ;;  %s50_s17 = sadd.s32 1, %s632_s12 }
   0x9   : > { %p40_p0 = scmp.ge.s32.totalorder %s38_s16, 2  ;;  %s65_s18 = sadd.s32 1, %s616_s8 }
   0xa   : > { %p72_p1 = scmp.ne.s32.totalorder %s616_s8, %s612_s7  ;;  %p73_p2 = scmp.eq.s32.totalorder %s636_s13, 0 }
   0xb   : > { %s875_s16 = smov (%p40_p0, %s38_s16), 0  ;;  %s877_s17 = smov (!%p40_p0, %s50_s17), %s632_s12 }
   0xc   : > { %s59_s19 = ssub.s32 %s628_s11, %s875_s16  ;;  %p711_p3 = por %p73_p2, %p72_p1 }
   0xd   : > { %p52_p4 = scmp.ge.s32.totalorder %s877_s17, 2  ;;  %p78_p5 = scmp.ne.s32.totalorder %s612_s7, %s608_s6 }
   0xe   : > { %p79_p6 = scmp.eq.s32.totalorder %s398_s14, 0  ;;  %p110_p7 = scmp.eq.s32.totalorder %s398_s14, 3 }
   0xf   : > { %s879_s17 = smov (%p52_p4, %s877_s17), 0  ;;  %p116_p10 = scmp.eq.s32.totalorder %s399_s15, 3 }
  0x10   : > { %p719_p8 = por %p79_p6, %p78_p5  ;;  %p723_p9 = por %p110_p7, %p72_p1 }
  0x11   : > { %s54_s23 = ssub.s32 %s632_s12, %s879_s17  ;;  %p729_p12 = por %p116_p10, %p78_p5 }
  0x12   : > { %s862_s22 = scalar_select %p723_p9, 1, 0 }
  0x13   : > { %s60_s24 = sor.u32 %s59_s19, %s54_s23  ;;  %p430_p13 = scmp.lt.s32.totalorder %s636_s13, 4 }
  0x14   : > { %p63_p11 = scmp.eq.s32.totalorder %s60_s24, 0  ;;  %s136_s26 = sand.u32 1, %s616_s8  }
  0x15   : > { %s863_s25 = scalar_select %p729_p12, 1, 0 }
  0x16   : > { %s736_s27 = scalar_select %p63_p11, %s616_s8, %s65_s18  }
  0x17   : > { %s402_s28 = sshll.u32 %s136_s26, 5  ;;  %s403_s29 = sshll.u32 %s632_s12, 3 }
  0x18   : > { %s151_s30 = sadd.s32 %s628_s11, %s403_s29  ;;  %s140_s2 = scalar_lea.vmem [#allocation2], %s402_s28 }
  0x19   : > { %s154_s3 = sshll.u32 %s140_s2, 4  ;;  %s404_s4 = sshll.u32 %s151_s30, 7  ;;  %s740_s3 = int_to_ptr.vmem [resolvable:$true] %s154_s3 }
  0x1a   : > { %s745_s15 = scalar_lea.hbm %s857_s0, %s404_s4  ;;  %p749_p0 = pnand %p430_p13, %p711_p3 }
  0x1b   : > { %s753_s19 = scalar_lea.sflag [#allocation3], %s136_s26  ;;  %s508_s23 = scalar_lea.hbm %s745_s15, 512 }
  0x1c   : > { %p509_p1 = scmp.ne.s32.totalorder %s745_s15, %s508_s23  ;;  %p510_p2 = pneg %p749_p0 }
  0x1d   : > { %s513_s28 = scalar_lea.hbm %s857_s0, 2048  ;;  %p514_p3 = scmp.lt.u32.totalorder %s745_s15, %s857_s0 }
  0x1e   : > { %p511_p4 = pnand %p510_p2, %p509_p1  ;;  %p515_p6 = scmp.lt.u32.totalorder %s513_s28, %s508_s23 }
  0x1f   : > { %p517_p10 = scmp.lt.u32.totalorder %s508_s23, %s745_s15 }
  0x20   : > { %p512_p5 = pneg %p511_p4  ;;  %p516_p7 = por %p515_p6, %p514_p3 }
  0x22   : > { %p518_p11 = por %p517_p10, %p516_p7 }
  0x24   : > { %p519_p13 = pnand %p518_p11, %p512_p5 }
  0x26   : > { %522 = shalt.err (!%p519_p13)
}
  0x27   : > { %s523_s26 = scalar_lea.vmem %s740_s3, 512  ;;  %s638_s2 = smov [#allocation2]  }
  0x28   : > { %p524_p1 = scmp.ne.s32.totalorder %s740_s3, %s523_s26  ;;  %s528_s4 = sshll.u32 %s638_s2, 4  ;;  %s529_s4 = int_to_ptr.vmem [resolvable:$false] %s528_s4 }
  0x29   : > { %s530_s5 = scalar_lea.vmem %s529_s4, 1024  ;;  %p531_p9 = scmp.lt.s32.totalorder %s740_s3, %s529_s4 }
  0x2a   : > { %p526_p4 = pnand %p524_p1, %p510_p2  ;;  %p532_p3 = scmp.lt.s32.totalorder %s530_s5, %s523_s26 }
  0x2c   : > { %p527_p12 = pneg %p526_p4  ;;  %p533_p6 = por %p532_p3, %p531_p9 }
  0x2e   : > { %p534_p7 = pnand %p533_p6, %p527_p12 }
  0x30   : > { %537 = shalt.err (!%p534_p7)
}
  0x31   : > { %s639_s14 = smov 256   ;;  %s640_s23 = smov 128  }
  0x32   : > { %s641_s20 = smov 8   ;;  %p405_p2 = scmp.ge.s32.totalorder %s636_s13, 1 }
  0x33   : > { %425 = dma.hbm_to_vmem [thread:$0]  (!%p749_p0), %s745_s15, 512, %s740_s3, %s753_s19, %s639_s14, %s640_s23, %s641_s20  }
  0x34   : > { %p162_p5 = scmp.lt.s32.totalorder %s636_s13, 5 }
  0x36   : > { %p163_p10 = pnand %p405_p2, %p162_p5 }
  0x37   : > { %s784_s24 = sand.u32 (!%p163_p10), 1, %s612_s7  }
  0x38   : > { %166 = sbr.rel (%p163_p10) target bundleno = 95 (0x5f), region = 24  ;;  %s406_s28 = sshll.u32 (!%p163_p10), %s784_s24, 5 }
  0x39   : > { %s169_s29 = scalar_lea.sflag (!%p163_p10), [#allocation3], %s784_s24  ;;  %s172_s30 = scalar_lea.vmem (!%p163_p10), [#allocation2], %s406_s28 }
  0x3f   : > { %599 = dma.done.wait (%p719_p8), %s169_s29, 512  }
  0x40   : > { %601 = vsyncadd (%p719_p8), %s169_s29, 4294966784  ;;  %v202_v0 = vlaneseq  ;;  %v642_v1 = vmov 1983009808   ;;  %v643_v4 = vmov 1934713408   ;;  %v193_v9 = vld [vmem:[%s172_s30] sm:$0xff] }
  0x41   : > { %v200_v2 = vunpack.c.l.s4 %v642_v1  ;;  %v232_v5 = vunpack.c.l.s4 %v643_v4  ;;  %v194_v10 = vld [vmem:[%s172_s30 + $0x8] sm:$0xff]  ;;  %v195_v11 = vld [vmem:[%s172_s30 + $0x10] sm:$0xff]  ;;  %s413_s3 = sshll.u32 %s620_s9, 3  ;;  %v196_v12 = vld [vmem:[%s172_s30 + $0x18] sm:$0xff]  ;;  %s414_s21 = sshll.u32 %s624_s10, 4  ;;  %v644_v30 = vmov 0.0  }
  0x42   : > { %v203_v3 = vshrl.u32 %v202_v0, 7  ;;  %v504_v13 = vld [vmem:[%s172_s30] ss:$16 sps:$4 sm:$0xff]   ;;  %v506_v14 = vld [vmem:[%s172_s30 + $0x8] ss:$16 sps:$4 sm:$0xff]   ;;  %v198_v15 = vcombine.high %v193_v9, %v195_v11  ;;  %v214_v16 = vcombine.high %v194_v10, %v196_v12  ;;  %s289_s15 = sadd.s32 %s414_s21, %s413_s3  ;;  %s190_s18 = scalar_lea.vmem [#allocation5], %s406_s28 }
  0x43   : > { %v201_v6 = vunpack.c.0.s8 %v200_v2  ;;  %v233_v8 = vunpack.c.0.s8 %v232_v5  ;;  %s292_s19 = sshll.u32 %s190_s18, 4  ;;  %s415_s9 = sshll.u32 %s289_s15, 6  ;;  %s798_s19 = int_to_ptr.vmem [resolvable:$true] %s292_s19 }
  0x44   : > { %s803_s2 = scalar_lea.hbm %s858_s1, %s415_s9  ;;  %s274_s4 = scalar_lea.sflag [#allocation4], %s784_s24 }
  0x45   : > { %v204_v7 = vsub.s32 %v201_v6, %v203_v3  ;;  %v236_v19 = vsub.s32 %v233_v8, %v203_v3  ;;  %s538_s5 = scalar_lea.vmem %s798_s19, 512  ;;  %p865_p9 = scmp.ne.s32.totalorder %s862_s22, 0 }
  0x46   : > { %p539_p8 = scmp.ne.s32.totalorder %s798_s19, %s538_s5  ;;  %s645_s14 = smov [#allocation5]  }
  0x47   : > { %v205_v17 = vrot.slane %v504_v13, %v204_v7  ;;  %v221_v18 = vrot.slane %v506_v14, %v204_v7  ;;  %v212_v20 = vrot.slane %v198_v15, %v204_v7  ;;  %v228_v21 = vrot.slane %v214_v16, %v204_v7  ;;  %s542_s23 = sshll.u32 %s645_s14, 4  ;;  %s543_s23 = int_to_ptr.vmem [resolvable:$false] %s542_s23 }
  0x48   : > { %p540_p12 = pnand %p539_p8, %p865_p9  ;;  %s544_s20 = scalar_lea.vmem %s543_s23, 1024 }
  0x49   : > { %v229_v22 = vcombine.low %v205_v17, %v221_v18  ;;  %v230_v23 = vcombine.high %v205_v17, %v221_v18  ;;  %v245_v24 = vcombine.low %v212_v20, %v228_v21  ;;  %v246_v25 = vcombine.high %v212_v20, %v228_v21  ;;  %p545_p11 = scmp.lt.s32.totalorder %s798_s19, %s543_s23  ;;  %p546_p13 = scmp.lt.s32.totalorder %s544_s20, %s538_s5 }
  0x4a   : > { %p541_p0 = pneg %p540_p12 }
  0x4b   : > { %408 = vst.sshfl [vmem:[%s190_s18] sm:$0x55 pattern:$0x73516240] %v229_v22  ;;  %v237_v26 = vrot.slane %v229_v22, %v236_v19  ;;  %v244_v27 = vrot.slane %v230_v23, %v236_v19  ;;  %v253_v28 = vrot.slane %v245_v24, %v236_v19  ;;  %v260_v29 = vrot.slane %v246_v25, %v236_v19  ;;  %p547_p1 = por %p546_p13, %p545_p11 }
  0x4c   : > { %409 = vst.sshfl [vmem:[%s190_s18 + $0x8] sm:$0x55 pattern:$0x73516240] %v230_v23 }
  0x4d   : > { %410 = vst.sshfl [vmem:[%s190_s18 + $0x10] sm:$0x55 pattern:$0x73516240] %v245_v24  ;;  %v261_v31 = vcombine.high %v237_v26, %v644_v30  ;;  %v262_v32 = vcombine.high %v244_v27, %v644_v30  ;;  %v263_v33 = vcombine.high %v253_v28, %v644_v30  ;;  %v264_v34 = vcombine.high %v260_v29, %v644_v30  ;;  %p548_p4 = pnand %p547_p1, %p541_p0 }
  0x4e   : > { %411 = vst.sshfl [vmem:[%s190_s18 + $0x18] sm:$0x55 pattern:$0x73516240] %v246_v25 }
  0x4f   : > { %266 = vst [vmem:[%s190_s18 + $0x4] sm:$0xf] %v261_v31  ;;  %268 = vst [vmem:[%s190_s18 + $0xc] sm:$0xf] %v262_v32 }
  0x50   : > { %270 = vst [vmem:[%s190_s18 + $0x14] sm:$0xf] %v263_v33  ;;  %272 = vst [vmem:[%s190_s18 + $0x1c] sm:$0xf] %v264_v34 }
  0x51   : > { %551 = shalt.err (!%p548_p4)
}
  0x52   : > { %s552_s28 = scalar_lea.hbm %s803_s2, 512  ;;  %s556_s3 = scalar_lea.hbm %s858_s1, 2048 }
  0x53   : > { %p553_p3 = scmp.ne.s32.totalorder %s803_s2, %s552_s28  ;;  %p557_p2 = scmp.lt.u32.totalorder %s803_s2, %s858_s1 }
  0x54   : > { %p558_p5 = scmp.lt.u32.totalorder %s556_s3, %s552_s28  ;;  %p560_p8 = scmp.lt.u32.totalorder %s552_s28, %s803_s2 }
  0x55   : > { %p554_p6 = pnand %p553_p3, %p865_p9 }
  0x56   : > { %p559_p10 = por %p558_p5, %p557_p2 }
  0x57   : > { %p555_p7 = pneg %p554_p6 }
  0x58   : > { %p561_p12 = por %p560_p8, %p559_p10 }
  0x5a   : > { %p562_p0 = pnand %p561_p12, %p555_p7 }
  0x5c   : > { %565 = shalt.err (!%p562_p0)
}
  0x5d   : > { %s646_s18 = smov 64   ;;  %s647_s9 = smov 4  }
  0x5e   : > { %420 = dma.vmem_to_hbm [thread:$0]  (%p865_p9), %s798_s19, 512, %s803_s2, %s274_s4, %s646_s18, %s646_s18, %s647_s9  }
  0x5f PF: > { %p431_p11 = scmp.ge.s32.totalorder %s636_s13, 2  ;;  %s307_s10 = sand.u32 1, %s608_s6  }
  0x60   : > { %p866_p13 = scmp.ne.s32.totalorder %s863_s25, 0  ;;  %s308_s26 = scalar_lea.sflag [#allocation4], %s307_s10 }
  0x62   : > { %p427_p1 = pnand %p431_p11, %p866_p13 }
  0x64   : > { %603 = dma.done.wait (!%p427_p1), %s308_s26, 512  }
  0x65   : > { %605 = vsyncadd (!%p427_p1), %s308_s26, 4294966784  ;;  %s17_s13 = sadd.s32 1, %s636_s13   ;;  %s867_s6 = smov %s612_s7 }
  0x66   : > { %p14_p4 = scmp.ge.s32.totalorder %s17_s13, 6   ;;  %s868_s7 = smov %s616_s8 }
  0x67   : > { %s869_s8 = smov %s736_s27  ;;  %s870_s9 = smov %s628_s11 }
  0x68   : > { %s871_s10 = smov %s632_s12  ;;  %s872_s11 = smov %s875_s16 }
  0x69   : > { %s873_s12 = smov %s879_s17  ;;  %16 = sbr.rel (!%p14_p4) target bundleno = 7 (0x7), region = 69 }
  0x70   :  { %313 = vsyncpa [#allocation3], 1 }
  0x71   :  { %315 = vsyncpa [#allocation3 + $0x1], 1 }
  0x72   :  { %316 = vsyncpa [#allocation4], 1 }
  0x73   :  { %318 = vsyncpa [#allocation4 + $0x1], 1 }

</bundles_post_ra>
